<compile_context>
chip_gen: v5e
topology: v5e:2x2
jax: 0.10.0
libtpu: 0.0.40
codegen_flags: <defaults>
</compile_context>

<pallas_src>
import functools

import jax
import jax.numpy as jnp
from jax.experimental import pallas as pl
from jax.experimental.pallas import tpu as pltpu

_LANES = 128
_SUBLANES = 8


def _tversky_partial_kernel(pred_ref, targ_ref, tp_ref, sp_ref, st_ref, *,
                            rows, rows_per_tile, needs_mask):
    """Accumulates vreg-sized (8,128) partials of p*t, p and t per core."""
    c = pl.program_id(0)          # "parallel" core axis
    i = pl.program_id(1)          # "arbitrary" reduction axis

    @pl.when(i == 0)
    def _init():
        tp_ref[...] = jnp.zeros_like(tp_ref)
        sp_ref[...] = jnp.zeros_like(sp_ref)
        st_ref[...] = jnp.zeros_like(st_ref)

    p = jax.nn.sigmoid(pred_ref[...].astype(jnp.float32))
    t = targ_ref[...].astype(jnp.float32)

    if needs_mask:
        # Global (unclamped) row index of every element in this block.  The
        # ragged rows of the last tile and any fully out-of-range block (tile
        # count not a multiple of the core count) are zeroed here; jnp.where
        # also squashes NaNs the sigmoid may produce on undefined OOB data.
        block = c * pl.num_programs(1) + i
        row0 = block * rows_per_tile
        row_idx = row0 + jax.lax.broadcasted_iota(
            jnp.int32, (rows_per_tile, _LANES), 0)
        valid = row_idx < rows
        p = jnp.where(valid, p, 0.0)
        t = jnp.where(valid, t, 0.0)

    # Per-tile reduction down to one vreg-sized (8, 128) partial: reshaping
    # (rows_per_tile, 128) -> (sub, 8, 128) is vreg-granular, and the sum over
    # the leading axis is pure VPU adds (hidden under the input DMA).
    sub = rows_per_tile // _SUBLANES
    tp_ref[...] += jnp.sum((p * t).reshape(sub, _SUBLANES, _LANES), axis=0)
    sp_ref[...] += jnp.sum(p.reshape(sub, _SUBLANES, _LANES), axis=0)
    st_ref[...] += jnp.sum(t.reshape(sub, _SUBLANES, _LANES), axis=0)


def _partial_sums_pallas(pred2d, targ2d, *, rows_per_tile, num_cores):
    """Returns (sum(p*t), sum(p), sum(t)) over a (rows, 128) slab."""
    rows = pred2d.shape[0]
    num_tiles = pl.cdiv(rows, rows_per_tile)
    num_cores = max(1, min(num_cores, num_tiles))
    tiles_per_core = pl.cdiv(num_tiles, num_cores)
    needs_mask = (rows % rows_per_tile != 0) or \
                 (num_cores * tiles_per_core != num_tiles)

    def imap(c, i):
        # Clamp fully out-of-range blocks (only when num_tiles % num_cores
        # != 0) onto the last valid block; their contribution is masked to 0
        # in-kernel via the unclamped row index.
        return (jnp.minimum(c * tiles_per_core + i, num_tiles - 1), 0)

    in_spec = pl.BlockSpec((rows_per_tile, _LANES), imap)
    out_spec = pl.BlockSpec((None, _SUBLANES, _LANES), lambda c, i: (c, 0, 0))
    out_sds = jax.ShapeDtypeStruct((num_cores, _SUBLANES, _LANES), jnp.float32)

    kernel = functools.partial(
        _tversky_partial_kernel, rows=rows, rows_per_tile=rows_per_tile,
        needs_mask=needs_mask)

    tp_part, sp_part, st_part = pl.pallas_call(
        kernel,
        out_shape=(out_sds, out_sds, out_sds),
        grid_spec=pltpu.PrefetchScalarGridSpec(
            num_scalar_prefetch=0,
            grid=(num_cores, tiles_per_core),
            in_specs=[in_spec, in_spec],
            out_specs=(out_spec, out_spec, out_spec),
        ),
        compiler_params=pltpu.CompilerParams(
            dimension_semantics=("parallel", "arbitrary")),
    )(pred2d, targ2d)

    return jnp.sum(tp_part), jnp.sum(sp_part), jnp.sum(st_part)


def tversky_loss(pred, target, *, alpha=0.5, beta=0.5, smooth=1.0,
                 rows_per_tile=2048, num_cores=2):
    """Pallas implementation of TverskyLoss.forward(pred, target)."""
    assert pred.shape == target.shape
    n = int(pred.size)
    assert n > 0

    if not jnp.issubdtype(pred.dtype, jnp.floating):
        pred = pred.astype(jnp.float32)
    pred_flat = pred.reshape(-1)
    targ_flat = target.reshape(-1)

    rows = n // _LANES
    rem = n - rows * _LANES

    tp = jnp.float32(0.0)
    sp = jnp.float32(0.0)
    st = jnp.float32(0.0)

    if rows > 0:
        main = rows * _LANES
        if rem:
            # Only the aligned prefix goes to the kernel; the <128-element
            # tail is folded in below with plain jnp (no whole-array pad).
            pred2d = pred_flat[:main].reshape(rows, _LANES)
            targ2d = targ_flat[:main].reshape(rows, _LANES)
        else:
            # Common case: zero-copy reshape, no pad, no slice.
            pred2d = pred_flat.reshape(rows, _LANES)
            targ2d = targ_flat.reshape(rows, _LANES)

        rpt = min(int(rows_per_tile),
                  max(_SUBLANES, (rows // _SUBLANES) * _SUBLANES))
        tp_k, sp_k, st_k = _partial_sums_pallas(
            pred2d, targ2d, rows_per_tile=rpt, num_cores=int(num_cores))
        tp = tp + tp_k
        sp = sp + sp_k
        st = st + st_k

    if rem > 0:
        p_tail = jax.nn.sigmoid(pred_flat[rows * _LANES:].astype(jnp.float32))
        t_tail = targ_flat[rows * _LANES:].astype(jnp.float32)
        tp = tp + jnp.sum(p_tail * t_tail)
        sp = sp + jnp.sum(p_tail)
        st = st + jnp.sum(t_tail)

    fp = sp - tp
    fn = st - tp
    tversky = (tp + float(smooth)) / (
        tp + float(alpha) * fp + float(beta) * fn + float(smooth))
    return 1.0 - tversky


def _tversky_ref(pred, target, alpha=0.5, beta=0.5, smooth=1.0):
    p = jax.nn.sigmoid(pred.astype(jnp.float32)).reshape(-1)
    t = target.astype(jnp.float32).reshape(-1)
    tp = jnp.sum(p * t)
    fp = jnp.sum((1.0 - t) * p)
    fn = jnp.sum(t * (1.0 - p))
    tversky = (tp + smooth) / (tp + alpha * fp + beta * fn + smooth)
    return 1.0 - tversky


if __name__ == "__main__":
    key = jax.random.PRNGKey(0)
    kp, kt, kp2, kt2, kp3, kt3 = jax.random.split(key, 6)

    # 1) NCHW segmentation-style logits / binary mask (128-aligned, no mask).
    pred = jax.random.normal(kp, (2, 4, 16, 16), dtype=jnp.float32) * 3.0
    target = (jax.random.uniform(kt, (2, 4, 16, 16)) > 0.5).astype(jnp.float32)
    out = jax.block_until_ready(tversky_loss(pred, target))
    ref = _tversky_ref(pred, target)
    assert jnp.allclose(out, ref, rtol=1e-5, atol=1e-6), (out, ref)

    # 2) Element count not a multiple of 128 -> ragged last tile masked
    #    in-kernel + sub-128 tail folded in the wrapper.
    pred2 = jax.random.normal(kp2, (3, 5, 7, 11), dtype=jnp.float32)
    target2 = (jax.random.uniform(kt2, (3, 5, 7, 11)) > 0.5).astype(jnp.float32)
    out2 = jax.block_until_ready(tversky_loss(pred2, target2))
    ref2 = _tversky_ref(pred2, target2)
    assert jnp.allclose(out2, ref2, rtol=1e-5, atol=1e-6), (out2, ref2)

    # 3) Force the multi-tile, two-core grid (with a ragged tile and a clamped
    #    out-of-range block) using a small tile on a 64-row input.
    pred3 = jax.random.normal(kp3, (2, 4, 32, 32), dtype=jnp.float32) * 2.0
    target3 = (jax.random.uniform(kt3, (2, 4, 32, 32)) > 0.5).astype(jnp.float32)
    out3 = jax.block_until_ready(
        tversky_loss(pred3, target3, rows_per_tile=24, num_cores=2))
    ref3 = _tversky_ref(pred3, target3)
    assert jnp.allclose(out3, ref3, rtol=1e-5, atol=1e-6), (out3, ref3)

    print("KERNEL_OK")
</pallas_src>

<mosaic_0001>
module attributes {stable_mosaic.version = 11 : i64} {
  func.func @_tversky_partial_kernel(%arg0: i32, %arg1: i32, %arg2: memref<16x128xf32, #tpu.memory_space<vmem>>, %arg3: memref<16x128xf32, #tpu.memory_space<vmem>>, %arg4: memref<1x8x128xf32, #tpu.memory_space<vmem>>, %arg5: memref<1x8x128xf32, #tpu.memory_space<vmem>>, %arg6: memref<1x8x128xf32, #tpu.memory_space<vmem>>) attributes {dimension_semantics = [#tpu.dimension_semantics<parallel>, #tpu.dimension_semantics<arbitrary>], iteration_bounds = array<i64: 1, 1>, scalar_prefetch = 0 : i64, scratch_operands = 0 : i64, tpu.core_type = #tpu.core_type<tc>, window_params = [{transform_indices = @transform_0, window_bounds = array<i64: 16, 128>}, {transform_indices = @transform_1, window_bounds = array<i64: 16, 128>}, {transform_indices = @transform_2, window_bounds = array<i64: 1, 8, 128>}, {transform_indices = @transform_3, window_bounds = array<i64: 1, 8, 128>}, {transform_indices = @transform_4, window_bounds = array<i64: 1, 8, 128>}]} {
    %c0_i32 = arith.constant 0 : i32
    %0 = arith.cmpi eq, %arg1, %c0_i32 : i32
    %1 = arith.extui %0 : i1 to i32
    %c0_i32_0 = arith.constant 0 : i32
    %2 = arith.cmpi ne, %1, %c0_i32_0 : i32
    scf.if %2 {
      %cst_25 = arith.constant 0.000000e+00 : f32
      %35 = vector.broadcast %cst_25 : f32 to vector<8x128xf32>
      %c0_26 = arith.constant 0 : index
      %c0_27 = arith.constant 0 : index
      %c0_28 = arith.constant 0 : index
      %36 = vector.load %arg4[%c0_26, %c0_27, %c0_28] : memref<1x8x128xf32, #tpu.memory_space<vmem>>, vector<1x8x128xf32>
      %37 = vector.shape_cast %36 : vector<1x8x128xf32> to vector<8x128xf32>
      %38 = vector.shape_cast %35 : vector<8x128xf32> to vector<1x8x128xf32>
      tpu.vector_store %arg4[%c0_26, %c0_27, %c0_28], %38 {strides = array<i32>} : memref<1x8x128xf32, #tpu.memory_space<vmem>>, vector<1x8x128xf32>,
      %cst_29 = arith.constant 0.000000e+00 : f32
      %39 = vector.broadcast %cst_29 : f32 to vector<8x128xf32>
      %c0_30 = arith.constant 0 : index
      %c0_31 = arith.constant 0 : index
      %c0_32 = arith.constant 0 : index
      %40 = vector.load %arg5[%c0_30, %c0_31, %c0_32] : memref<1x8x128xf32, #tpu.memory_space<vmem>>, vector<1x8x128xf32>
      %41 = vector.shape_cast %40 : vector<1x8x128xf32> to vector<8x128xf32>
      %42 = vector.shape_cast %39 : vector<8x128xf32> to vector<1x8x128xf32>
      tpu.vector_store %arg5[%c0_30, %c0_31, %c0_32], %42 {strides = array<i32>} : memref<1x8x128xf32, #tpu.memory_space<vmem>>, vector<1x8x128xf32>,
      %cst_33 = arith.constant 0.000000e+00 : f32
      %43 = vector.broadcast %cst_33 : f32 to vector<8x128xf32>
      %c0_34 = arith.constant 0 : index
      %c0_35 = arith.constant 0 : index
      %c0_36 = arith.constant 0 : index
      %44 = vector.load %arg6[%c0_34, %c0_35, %c0_36] : memref<1x8x128xf32, #tpu.memory_space<vmem>>, vector<1x8x128xf32>
      %45 = vector.shape_cast %44 : vector<1x8x128xf32> to vector<8x128xf32>
      %46 = vector.shape_cast %43 : vector<8x128xf32> to vector<1x8x128xf32>
      tpu.vector_store %arg6[%c0_34, %c0_35, %c0_36], %46 {strides = array<i32>} : memref<1x8x128xf32, #tpu.memory_space<vmem>>, vector<1x8x128xf32>,
    } else {
    }
    %c0 = arith.constant 0 : index
    %c0_1 = arith.constant 0 : index
    %3 = vector.load %arg2[%c0, %c0_1] : memref<16x128xf32, #tpu.memory_space<vmem>>, vector<16x128xf32>
    %4 = arith.negf %3 : vector<16x128xf32>
    %5 = math.exp %4 : vector<16x128xf32>
    %cst = arith.constant 1.000000e+00 : f32
    %6 = vector.broadcast %cst : f32 to vector<16x128xf32>
    %7 = arith.addf %6, %5 : vector<16x128xf32>
    %8 = arith.divf %6, %7 : vector<16x128xf32>
    %c0_2 = arith.constant 0 : index
    %c0_3 = arith.constant 0 : index
    %9 = vector.load %arg3[%c0_2, %c0_3] : memref<16x128xf32, #tpu.memory_space<vmem>>, vector<16x128xf32>
    %c0_4 = arith.constant 0 : index
    %c0_5 = arith.constant 0 : index
    %c0_6 = arith.constant 0 : index
    %10 = vector.load %arg4[%c0_4, %c0_5, %c0_6] : memref<1x8x128xf32, #tpu.memory_space<vmem>>, vector<1x8x128xf32>
    %11 = vector.shape_cast %10 : vector<1x8x128xf32> to vector<8x128xf32>
    %12 = arith.mulf %8, %9 : vector<16x128xf32>
    %13 = vector.shape_cast %12 : vector<16x128xf32> to vector<2x8x128xf32>
    %cst_7 = arith.constant dense<0.000000e+00> : vector<8x128xf32>
    %14 = vector.multi_reduction <add>, %13, %cst_7 [0] : vector<2x8x128xf32> to vector<8x128xf32>
    %15 = arith.addf %11, %14 : vector<8x128xf32>
    %c0_8 = arith.constant 0 : index
    %c0_9 = arith.constant 0 : index
    %c0_10 = arith.constant 0 : index
    %16 = vector.load %arg4[%c0_8, %c0_9, %c0_10] : memref<1x8x128xf32, #tpu.memory_space<vmem>>, vector<1x8x128xf32>
    %17 = vector.shape_cast %16 : vector<1x8x128xf32> to vector<8x128xf32>
    %18 = vector.shape_cast %15 : vector<8x128xf32> to vector<1x8x128xf32>
    tpu.vector_store %arg4[%c0_8, %c0_9, %c0_10], %18 {strides = array<i32>} : memref<1x8x128xf32, #tpu.memory_space<vmem>>, vector<1x8x128xf32>,
    %c0_11 = arith.constant 0 : index
    %c0_12 = arith.constant 0 : index
    %c0_13 = arith.constant 0 : index
    %19 = vector.load %arg5[%c0_11, %c0_12, %c0_13] : memref<1x8x128xf32, #tpu.memory_space<vmem>>, vector<1x8x128xf32>
    %20 = vector.shape_cast %19 : vector<1x8x128xf32> to vector<8x128xf32>
    %21 = vector.shape_cast %8 : vector<16x128xf32> to vector<2x8x128xf32>
    %cst_14 = arith.constant dense<0.000000e+00> : vector<8x128xf32>
    %22 = vector.multi_reduction <add>, %21, %cst_14 [0] : vector<2x8x128xf32> to vector<8x128xf32>
    %23 = arith.addf %20, %22 : vector<8x128xf32>
    %c0_15 = arith.constant 0 : index
    %c0_16 = arith.constant 0 : index
    %c0_17 = arith.constant 0 : index
    %24 = vector.load %arg5[%c0_15, %c0_16, %c0_17] : memref<1x8x128xf32, #tpu.memory_space<vmem>>, vector<1x8x128xf32>
    %25 = vector.shape_cast %24 : vector<1x8x128xf32> to vector<8x128xf32>
    %26 = vector.shape_cast %23 : vector<8x128xf32> to vector<1x8x128xf32>
    tpu.vector_store %arg5[%c0_15, %c0_16, %c0_17], %26 {strides = array<i32>} : memref<1x8x128xf32, #tpu.memory_space<vmem>>, vector<1x8x128xf32>,
    %c0_18 = arith.constant 0 : index
    %c0_19 = arith.constant 0 : index
    %c0_20 = arith.constant 0 : index
    %27 = vector.load %arg6[%c0_18, %c0_19, %c0_20] : memref<1x8x128xf32, #tpu.memory_space<vmem>>, vector<1x8x128xf32>
    %28 = vector.shape_cast %27 : vector<1x8x128xf32> to vector<8x128xf32>
    %29 = vector.shape_cast %9 : vector<16x128xf32> to vector<2x8x128xf32>
    %cst_21 = arith.constant dense<0.000000e+00> : vector<8x128xf32>
    %30 = vector.multi_reduction <add>, %29, %cst_21 [0] : vector<2x8x128xf32> to vector<8x128xf32>
    %31 = arith.addf %28, %30 : vector<8x128xf32>
    %c0_22 = arith.constant 0 : index
    %c0_23 = arith.constant 0 : index
    %c0_24 = arith.constant 0 : index
    %32 = vector.load %arg6[%c0_22, %c0_23, %c0_24] : memref<1x8x128xf32, #tpu.memory_space<vmem>>, vector<1x8x128xf32>
    %33 = vector.shape_cast %32 : vector<1x8x128xf32> to vector<8x128xf32>
    %34 = vector.shape_cast %31 : vector<8x128xf32> to vector<1x8x128xf32>
    tpu.vector_store %arg6[%c0_22, %c0_23, %c0_24], %34 {strides = array<i32>} : memref<1x8x128xf32, #tpu.memory_space<vmem>>, vector<1x8x128xf32>,
    return
  }
  func.func @transform_0(%arg0: i32, %arg1: i32) -> (i32, i32) {
    %c1_i32 = arith.constant 1 : i32
    %0 = arith.muli %arg0, %c1_i32 : i32
    %1 = arith.addi %0, %arg1 : i32
    %c0_i32 = arith.constant 0 : i32
    %2 = arith.minsi %1, %c0_i32 : i32
    %c0_i32_0 = arith.constant 0 : i32
    %c0_i32_1 = arith.constant 0 : i32
    return %2, %c0_i32_0 : i32, i32
  }
  func.func @transform_1(%arg0: i32, %arg1: i32) -> (i32, i32) {
    %c1_i32 = arith.constant 1 : i32
    %0 = arith.muli %arg0, %c1_i32 : i32
    %1 = arith.addi %0, %arg1 : i32
    %c0_i32 = arith.constant 0 : i32
    %2 = arith.minsi %1, %c0_i32 : i32
    %c0_i32_0 = arith.constant 0 : i32
    %c0_i32_1 = arith.constant 0 : i32
    return %2, %c0_i32_0 : i32, i32
  }
  func.func @transform_2(%arg0: i32, %arg1: i32) -> (i32, i32, i32) {
    %c0_i32 = arith.constant 0 : i32
    %c0_i32_0 = arith.constant 0 : i32
    %c0_i32_1 = arith.constant 0 : i32
    return %arg0, %c0_i32, %c0_i32_0 : i32, i32, i32
  }
  func.func @transform_3(%arg0: i32, %arg1: i32) -> (i32, i32, i32) {
    %c0_i32 = arith.constant 0 : i32
    %c0_i32_0 = arith.constant 0 : i32
    %c0_i32_1 = arith.constant 0 : i32
    return %arg0, %c0_i32, %c0_i32_0 : i32, i32, i32
  }
  func.func @transform_4(%arg0: i32, %arg1: i32) -> (i32, i32, i32) {
    %c0_i32 = arith.constant 0 : i32
    %c0_i32_0 = arith.constant 0 : i32
    %c0_i32_1 = arith.constant 0 : i32
    return %arg0, %c0_i32, %c0_i32_0 : i32, i32, i32
  }
}

</mosaic_0001>

<bundles_post_ra>
// kernel: tpu_custom_call.1
= control target key start
LH: loop header
LB: loop body
LE: loop exit
PB: predicated region body
PF: predicated region fallthrough
CT: control target
= control target key end

     0   :  { %10 = vsyncpa [#allocation3], 0  ;;  %s377_s0 = inlined_call_operand.hbm [shape: f32[16,128], index: 0, kind: input, shape index: {}]   ;;  %s378_s1 = inlined_call_operand.hbm [shape: f32[16,128], index: 1, kind: input, shape index: {}]   ;;  %s379_s2 = inlined_call_operand.hbm [shape: f32[1,8,128], index: 2, kind: output, shape index: {0}]   ;;  %s380_s3 = inlined_call_operand.hbm [shape: f32[1,8,128], index: 3, kind: output, shape index: {1}]   ;;  %s381_s4 = inlined_call_operand.hbm [shape: f32[1,8,128], index: 4, kind: output, shape index: {2}]  }
   0x1   :  { %11 = vsyncpa [#allocation6], 0 }
   0x2   :  { %12 = vsyncpa [#allocation4], 0 }
   0x3   :  { %13 = vsyncpa [#allocation9], 0  ;;  %s24_s17 = sshll.u32 %s377_s0, 4  ;;  %s330_s18 = smov [#allocation2]   ;;  %s25_s17 = int_to_ptr.hbm [resolvable:$true] %s24_s17 }
   0x4   :  { %s26_s19 = sshll.u32 %s330_s18, 4  ;;  %s43_s22 = sshll.u32 %s378_s1, 4  ;;  %s27_s19 = int_to_ptr.vmem [resolvable:$true] %s26_s19  ;;  %s44_s22 = int_to_ptr.hbm [resolvable:$true] %s43_s22 }
   0x5   :  { %s331_s23 = smov 128   ;;  %s332_s24 = smov 8  }
   0x6   :  { %32 = dma.hbm_to_vmem [thread:$0]  %s25_s17, 256, %s27_s19, [#allocation3], %s331_s23, %s331_s23, %s332_s24  }
   0x7   :  { %s333_s25 = smov [#allocation5]  }
   0x8   :  { %s45_s26 = sshll.u32 %s333_s25, 4  ;;  %s46_s26 = int_to_ptr.vmem [resolvable:$true] %s45_s26 }
   0x9   :  { %51 = dma.hbm_to_vmem [thread:$0]  %s44_s22, 256, %s46_s26, [#allocation6], %s331_s23, %s331_s23, %s332_s24  }
   0xa   :  { %322 = dma.done.wait [#allocation3], 256  }
   0xb   :  { %323 = vsyncadd [#allocation3], 4294967040 }
   0xc   :  { %324 = dma.done.wait [#allocation6], 256  }
   0xd   :  { %325 = vsyncadd [#allocation6], 4294967040  ;;  %v75_v0 = vld [vmem:[#allocation2] sm:$0xff]  ;;  %v76_v1 = vld [vmem:[#allocation2 + $0x8] sm:$0xff]  ;;  %s334_s0 = smov [#allocation8]   ;;  %s149_s29 = sshll.u32 %s380_s3, 4  ;;  %s150_s29 = int_to_ptr.hbm [resolvable:$true] %s149_s29 }
   0xe   :  { %v184_v2 = vmul.f32 -1.442695, %v75_v0  ;;  %v185_v3 = vmul.f32 -1.442695, %v76_v1  ;;  %v115_v4 = vld [vmem:[#allocation5] sm:$0xff]  ;;  %v116_v5 = vld [vmem:[#allocation5 + $0x8] sm:$0xff] }
   0xf   :  { %v128_v6 = vadd.f32 %v116_v5, %v115_v4  ;;  %s147_s1 = sshll.u32 %s334_s0, 4  ;;  %s335_s30 = smov [#allocation10]   ;;  %s148_s1 = int_to_ptr.vmem [resolvable:$true] %s147_s1 }
  0x10   :  { %194 = vpow2.f32 %v184_v2  ;;  %s158_s5 = sshll.u32 %s335_s30, 4  ;;  %s160_s8 = sshll.u32 %s381_s4, 4  ;;  %s159_s5 = int_to_ptr.vmem [resolvable:$true] %s158_s5  ;;  %s161_s8 = int_to_ptr.hbm [resolvable:$true] %s160_s8 }
  0x11   :  { %196 = vpow2.f32 %v185_v3  ;;  %130 = vst [vmem:[#allocation10] sm:$0xff] %v128_v6  ;;  %s336_s9 = smov [#allocation7]   ;;  %s138_s13 = sshll.u32 %s379_s2, 4  ;;  %s139_s13 = int_to_ptr.hbm [resolvable:$true] %s138_s13 }
  0x12   :  { %s136_s10 = sshll.u32 %s336_s9, 4  ;;  %s137_s10 = int_to_ptr.vmem [resolvable:$true] %s136_s10 }
  0x16   :  { %v195_v7 = vpop.eup %194 }
  0x17   :  { %v197_v8 = vpop.eup %196  ;;  %v83_v9 = vadd.f32 1.0, %v195_v7 }
  0x18   :  { %v84_v10 = vadd.f32 1.0, %v197_v8 }
  0x19   :  { %198 = vrcp.f32 %v83_v9  ;;  %vm90_vm0 = vweird.f32 %v83_v9  ;;  %v96_v14 = vand.u32 2147483648, %v83_v9  ;;  %v94_v17 = vand.u32 2147483647, %v83_v9 }
  0x1a   :  { %200 = vrcp.f32 %v84_v10  ;;  %v111_v18 = vand.u32 2147483648, %v84_v10  ;;  %vm105_vm2 = vweird.f32 %v84_v10  ;;  %v109_v20 = vand.u32 2147483647, %v84_v10 }
  0x1b   :  { %v97_v22 = vor.u32 1.1754944e-38, %v96_v14  ;;  %vm95_vm5 = vcmp.eq.f32.partialorder %v94_v17, 8.507059e+37 }
  0x1c   :  { %v112_v25 = vor.u32 1.1754944e-38, %v111_v18  ;;  %vm110_vm7 = vcmp.eq.f32.partialorder %v109_v20, 8.507059e+37 }
  0x1f   :  { %v199_v11 = vpop.eup %198 }
  0x20   :  { %v201_v12 = vpop.eup %200  ;;  %v86_v13 = vmul.f32 %v199_v11, %v83_v9  ;;  %vm91_vm1 = vweird.f32 %v199_v11 }
  0x21   :  { %v101_v15 = vmul.f32 %v201_v12, %v84_v10  ;;  %vm106_vm3 = vweird.f32 %v201_v12  ;;  %vm92_vm4 = vmor %vm90_vm0, %vm91_vm1 }
  0x22   :  { %v87_v16 = vsub.f32 1.0, %v86_v13  ;;  %vm107_vm6 = vmor %vm105_vm2, %vm106_vm3 }
  0x23   :  { %v102_v19 = vsub.f32 1.0, %v101_v15 }
  0x24   :  { %v88_v21 = vmul.f32 %v199_v11, %v87_v16 }
  0x25   :  { %v103_v23 = vmul.f32 %v201_v12, %v102_v19 }
  0x26   :  { %v89_v24 = vadd.f32 %v199_v11, %v88_v21 }
  0x27   :  { %v104_v26 = vadd.f32 %v201_v12, %v103_v23 }
  0x28   :  { %v93_v27 = vsel %vm92_vm4, %v199_v11, %v89_v24 }
  0x29   :  { %v98_v28 = vsel %vm95_vm5, %v97_v22, %v93_v27  ;;  %v108_v29 = vsel %vm107_vm6, %v201_v12, %v104_v26 }
  0x2a   :  { %v113_v30 = vsel %vm110_vm7, %v112_v25, %v108_v29  ;;  %v118_v31 = vmul.f32 %v115_v4, %v98_v28 }
  0x2b   :  { %v124_v32 = vadd.f32 %v113_v30, %v98_v28  ;;  %v119_v33 = vmul.f32 %v116_v5, %v113_v30 }
  0x2d   :  { %v120_v34 = vadd.f32 %v119_v33, %v118_v31  ;;  %126 = vst [vmem:[#allocation8] sm:$0xff] %v124_v32 }
  0x2e   :  { %152 = dma.vmem_to_hbm [thread:$0]  %s148_s1, 128, %s150_s29, [#allocation9]  }
  0x2f   :  { %122 = vst [vmem:[#allocation7] sm:$0xff] %v120_v34  ;;  %163 = dma.vmem_to_hbm [thread:$0]  %s159_s5, 128, %s161_s8, [#allocation9]  }
  0x30   :  { %141 = dma.vmem_to_hbm [thread:$0]  %s137_s10, 128, %s139_s13, [#allocation4]  }
  0x31   :  { %326 = dma.done.wait [#allocation4], 128  }
  0x32   :  { %327 = vsyncadd [#allocation4], 4294967168 }
  0x33   :  { %328 = dma.done.wait [#allocation9], 256  }
  0x34   :  { %329 = vsyncadd [#allocation9], 4294967040 }
  0x35   :  { %176 = vsyncpa [#allocation3], 1 }
  0x36   :  { %177 = vsyncpa [#allocation6], 1 }
  0x37   :  { %178 = vsyncpa [#allocation4], 1 }
  0x38   :  { %179 = vsyncpa [#allocation9], 1 }

</bundles_post_ra>
